<compile_context>
chip_gen: v6e
topology: v6e:2x2x1
jax: 0.10.0
libtpu: 0.0.40
codegen_flags: <defaults>
</compile_context>

<pallas_src>
import numpy as np
import jax
import jax.numpy as jnp
from jax.experimental import pallas as pl
from jax.experimental.pallas import tpu as pltpu  # noqa: F401  (TPU backend; no TPU-specific params needed here)

# ----------------------------- small-shape config (module-consistent) -------------------
B = 2         # batch
M = 20        # trajectory-mode tokens carried by traj_feature (ego_fut_mode)
D = 32        # embed_dims (config.tf_d_model, small test size)
C_COND = 256  # condition_dims of the ModulationLayer


# ------------------------------------- Pallas kernel ------------------------------------
def modulation_kernel(traj_ref, cond_ref, ws_ref, bs1_ref, wh_ref, bh_ref, o_ref):
    """Fused Mish -> Linear -> chunk(scale, shift) -> x * (1 + scale) + shift."""
    t = cond_ref[...]                                              # (B, C)  condition features
    # Numerically stable softplus, then Mish = t * tanh(softplus(t)).   (EUP: exp/log/tanh)
    sp = jnp.maximum(t, 0.0) + jnp.log1p(jnp.exp(-jnp.abs(t)))
    mish = t * jnp.tanh(sp)
    # Two small MXU contractions (C -> D).  "+1" of (1 + scale) is pre-folded into bs1.
    scale1 = jnp.dot(mish, ws_ref[...], preferred_element_type=jnp.float32) + bs1_ref[...]  # (B, D)
    shift = jnp.dot(mish, wh_ref[...], preferred_element_type=jnp.float32) + bh_ref[...]    # (B, D)
    x = traj_ref[...]                                              # (B, M, D)
    o_ref[...] = (x * scale1[:, None, :] + shift[:, None, :]).astype(o_ref.dtype)


# ------------------------------------- wrapper ------------------------------------------
def modulation_layer_forward(params, traj_feature, time_embed, global_cond=None,
                             global_img=None):
    """JAX/Pallas equivalent of ModulationLayer.forward (eval semantics)."""
    # Condition assembly exactly as the PyTorch module does it (cheap glue, rarely-used paths).
    global_feature = time_embed
    if global_cond is not None:
        global_feature = jnp.concatenate([global_cond, time_embed], axis=-1)
    if global_img is not None:
        b_, c_ = global_img.shape[0], global_img.shape[1]
        gi = jnp.transpose(global_img.reshape(b_, c_, -1), (0, 2, 1))  # flatten(2,3).permute(0,2,1)
        global_feature = jnp.concatenate([gi, global_feature], axis=-1)

    if global_feature.ndim == 3:
        # TODO(synk): only the singleton-token condition (shape (B, 1, C)) is handled in-kernel;
        # that is the shape the DiffusionDrive call site uses (scale/shift broadcast over modes).
        assert global_feature.shape[1] == 1, "multi-token condition not supported in this kernel"
        cond = global_feature[:, 0, :]
    else:
        cond = global_feature

    # Single fused launch: no grid, whole arrays resident in VMEM.
    return pl.pallas_call(
        modulation_kernel,
        out_shape=jax.ShapeDtypeStruct(traj_feature.shape, traj_feature.dtype),
    )(traj_feature, cond,
      params["w_scale"], params["b_scale1"],
      params["w_shift"], params["b_shift"])


# ------------------------------- deterministic parameters -------------------------------
def init_params(key):
    """PyTorch nn.Linear(condition_dims, 2*embed_dims)-style init, stored pre-transposed
    (y = x @ w + b) and pre-split into scale / shift halves for the kernel."""
    kw, kb = jax.random.split(key, 2)
    bound = 1.0 / np.sqrt(C_COND)
    w = jax.random.uniform(kw, (C_COND, 2 * D), jnp.float32, -bound, bound)
    b = jax.random.uniform(kb, (2 * D,), jnp.float32, -bound, bound)
    return {
        # raw weights (PyTorch-parity reference path)
        "w": w, "b": b,
        # pre-split / pre-fused for the kernel: chunk(2, dim=-1) -> first half = scale, second = shift
        # biases kept 2D (1, D) so they map lane-major in VMEM.
        "w_scale": w[:, :D], "b_scale1": (b[:D] + 1.0).reshape(1, D),  # "+1" folded into the bias
        "w_shift": w[:, D:], "b_shift": b[D:].reshape(1, D),
    }


# --------------------------------- pure-JAX reference -----------------------------------
def reference_forward(params, traj_feature, time_embed):
    t = time_embed[:, 0, :] if time_embed.ndim == 3 else time_embed
    mish = t * jnp.tanh(jax.nn.softplus(t))
    ss = mish @ params["w"] + params["b"]
    scale, shift = ss[:, :D], ss[:, D:]
    return traj_feature * (1.0 + scale)[:, None, :] + shift[:, None, :]


# ----------------------------------------- main -----------------------------------------
if __name__ == "__main__":
    key = jax.random.PRNGKey(0)
    k_par, k_tf, k_te = jax.random.split(key, 3)

    params = init_params(k_par)
    traj_feature = jax.random.normal(k_tf, (B, M, D), jnp.float32)
    time_embed = jax.random.normal(k_te, (B, 1, C_COND), jnp.float32)

    fwd = jax.jit(modulation_layer_forward)
    out = fwd(params, traj_feature, time_embed)
    jax.block_until_ready(out)

    ref = reference_forward(params, traj_feature, time_embed)

    assert out.shape == (B, M, D)
    assert np.all(np.isfinite(np.asarray(out)))
    np.testing.assert_allclose(np.asarray(out), np.asarray(ref), rtol=1e-5, atol=1e-5)
    print("KERNEL_OK")
</pallas_src>

<mosaic_0001>
module attributes {stable_mosaic.version = 11 : i64} {
  func.func @modulation_kernel(%arg0: memref<2x20x32xf32, #tpu.memory_space<vmem>>, %arg1: memref<2x256xf32, #tpu.memory_space<vmem>>, %arg2: memref<256x32xf32, #tpu.memory_space<vmem>>, %arg3: memref<1x32xf32, #tpu.memory_space<vmem>>, %arg4: memref<256x32xf32, #tpu.memory_space<vmem>>, %arg5: memref<1x32xf32, #tpu.memory_space<vmem>>, %arg6: memref<2x20x32xf32, #tpu.memory_space<vmem>>) attributes {dimension_semantics = [], scalar_prefetch = 0 : i64, scratch_operands = 0 : i64, tpu.core_type = #tpu.core_type<tc>} {
    %c0 = arith.constant 0 : index
    %c0_0 = arith.constant 0 : index
    %0 = vector.load %arg1[%c0, %c0_0] : memref<2x256xf32, #tpu.memory_space<vmem>>, vector<2x256xf32>
    %cst = arith.constant 0.000000e+00 : f32
    %1 = vector.broadcast %cst : f32 to vector<2x256xf32>
    %2 = arith.maximumf %0, %1 : vector<2x256xf32>
    %3 = math.absf %0 : vector<2x256xf32>
    %cst_1 = arith.constant 0.000000e+00 : f32
    %4 = vector.broadcast %cst_1 : f32 to vector<2x256xf32>
    %5 = arith.subf %4, %3 : vector<2x256xf32>
    %6 = math.exp %5 : vector<2x256xf32>
    %7 = math.log1p %6 : vector<2x256xf32>
    %8 = arith.addf %2, %7 : vector<2x256xf32>
    %9 = math.tanh %8 : vector<2x256xf32>
    %10 = arith.mulf %0, %9 : vector<2x256xf32>
    %c0_2 = arith.constant 0 : index
    %c0_3 = arith.constant 0 : index
    %11 = vector.load %arg2[%c0_2, %c0_3] : memref<256x32xf32, #tpu.memory_space<vmem>>, vector<256x32xf32>
    %cst_4 = arith.constant dense<0.000000e+00> : vector<2x32xf32>
    %12 = tpu.matmul %10, %11, %cst_4 {dimension_numbers = #tpu.dot_dimension_numbers<[1], [0], [0], [1], [0, 0, 1, 1], [], []>} : vector<2x256xf32>, vector<256x32xf32>, vector<2x32xf32> -> vector<2x32xf32>
    %c0_5 = arith.constant 0 : index
    %c0_6 = arith.constant 0 : index
    %13 = vector.load %arg3[%c0_5, %c0_6] : memref<1x32xf32, #tpu.memory_space<vmem>>, vector<1x32xf32>
    %14 = vector.broadcast %13 : vector<1x32xf32> to vector<2x32xf32>
    %15 = arith.addf %12, %14 : vector<2x32xf32>
    %c0_7 = arith.constant 0 : index
    %c0_8 = arith.constant 0 : index
    %16 = vector.load %arg4[%c0_7, %c0_8] : memref<256x32xf32, #tpu.memory_space<vmem>>, vector<256x32xf32>
    %cst_9 = arith.constant dense<0.000000e+00> : vector<2x32xf32>
    %17 = tpu.matmul %10, %16, %cst_9 {dimension_numbers = #tpu.dot_dimension_numbers<[1], [0], [0], [1], [0, 0, 1, 1], [], []>} : vector<2x256xf32>, vector<256x32xf32>, vector<2x32xf32> -> vector<2x32xf32>
    %c0_10 = arith.constant 0 : index
    %c0_11 = arith.constant 0 : index
    %18 = vector.load %arg5[%c0_10, %c0_11] : memref<1x32xf32, #tpu.memory_space<vmem>>, vector<1x32xf32>
    %19 = vector.broadcast %18 : vector<1x32xf32> to vector<2x32xf32>
    %20 = arith.addf %17, %19 : vector<2x32xf32>
    %c0_12 = arith.constant 0 : index
    %c0_13 = arith.constant 0 : index
    %c0_14 = arith.constant 0 : index
    %21 = vector.load %arg0[%c0_12, %c0_13, %c0_14] : memref<2x20x32xf32, #tpu.memory_space<vmem>>, vector<2x20x32xf32>
    %22 = vector.shape_cast %15 : vector<2x32xf32> to vector<2x1x32xf32>
    %23 = vector.broadcast %22 : vector<2x1x32xf32> to vector<2x20x32xf32>
    %24 = arith.mulf %21, %23 : vector<2x20x32xf32>
    %25 = vector.shape_cast %20 : vector<2x32xf32> to vector<2x1x32xf32>
    %26 = vector.broadcast %25 : vector<2x1x32xf32> to vector<2x20x32xf32>
    %27 = arith.addf %24, %26 : vector<2x20x32xf32>
    %c0_15 = arith.constant 0 : index
    %c0_16 = arith.constant 0 : index
    %c0_17 = arith.constant 0 : index
    %28 = vector.load %arg6[%c0_15, %c0_16, %c0_17] : memref<2x20x32xf32, #tpu.memory_space<vmem>>, vector<2x20x32xf32>
    tpu.vector_store %arg6[%c0_15, %c0_16, %c0_17], %27 {strides = array<i32>} : memref<2x20x32xf32, #tpu.memory_space<vmem>>, vector<2x20x32xf32>,
    return
  }
}

</mosaic_0001>

<bundles_post_ra>
// kernel: modulation_layer_forward.1
= control target key start
LH: loop header
LB: loop body
LE: loop exit
PB: predicated region body
PF: predicated region fallthrough
CT: control target
= control target key end

     0   :  { %vm354_vm1 = vcmask 261120   ;;  %vm357_vm2 = vcmask 257024   ;;  %s725_s2 = inlined_call_operand.vmem [shape: f32[256,32], index: 2, kind: input, shape index: {}]   ;;  %s726_s4 = inlined_call_operand.vmem [shape: f32[256,32], index: 4, kind: input, shape index: {}]   ;;  %s727_s1 = inlined_call_operand.vmem [shape: f32[2,256], index: 1, kind: input, shape index: {}]   ;;  %s728_s3 = inlined_call_operand.vmem [shape: f32[1,32], index: 3, kind: input, shape index: {}]   ;;  %s729_s5 = inlined_call_operand.vmem [shape: f32[1,32], index: 5, kind: input, shape index: {}]   ;;  %s730_s0 = inlined_call_operand.vmem [shape: f32[2,20,32], index: 0, kind: input, shape index: {}]   ;;  %s731_s6 = inlined_call_operand.vmem [shape: f32[2,20,32], index: 6, kind: output, shape index: {}]  }
   0x1   :  { %v72_v0 = vld [vmem:[%s725_s2 + $0xf8] sm:$0xff]  ;;  %v71_v4 = vld [vmem:[%s725_s2 + $0xf0] sm:$0xff]  ;;  %v70_v8 = vld [vmem:[%s725_s2 + $0xe8] sm:$0xff] }
   0x2   :  { %v192_v1 = vld [vmem:[%s726_s4 + $0xf8] sm:$0xff]  ;;  %368 = vmatprep.subr.mxu0 %v72_v0  ;;  %v191_v5 = vld [vmem:[%s726_s4 + $0xf0] sm:$0xff]  ;;  %v190_v9 = vld [vmem:[%s726_s4 + $0xe8] sm:$0xff] }
   0x3   :  { %v56_v2 = vld [vmem:[%s725_s2 + $0x78] sm:$0xff]  ;;  %403 = vmatprep.subr.mxu1 %v192_v1  ;;  %v55_v6 = vld [vmem:[%s725_s2 + $0x70] sm:$0xff]  ;;  %v54_v10 = vld [vmem:[%s725_s2 + $0x68] sm:$0xff] }
   0x4   :  { %v176_v3 = vld [vmem:[%s726_s4 + $0x78] sm:$0xff]  ;;  %369 = vmatpush3.msra.mxu0 %v56_v2  ;;  %v175_v7 = vld [vmem:[%s726_s4 + $0x70] sm:$0xff]  ;;  %v174_v11 = vld [vmem:[%s726_s4 + $0x68] sm:$0xff] }
   0x5   :  { %404 = vmatpush3.msra.mxu1 %v176_v3  ;;  %370 = vmatprep.subr.mxu0 %v71_v4  ;;  %v69_v12 = vld [vmem:[%s725_s2 + $0xe0] sm:$0xff]  ;;  %v68_v16 = vld [vmem:[%s725_s2 + $0xd8] sm:$0xff]  ;;  %v67_v20 = vld [vmem:[%s725_s2 + $0xd0] sm:$0xff] }
   0x6   :  { %405 = vmatprep.subr.mxu1 %v191_v5  ;;  %371 = vmatpush3.msra.mxu0 %v55_v6  ;;  %v189_v13 = vld [vmem:[%s726_s4 + $0xe0] sm:$0xff]  ;;  %v188_v17 = vld [vmem:[%s726_s4 + $0xd8] sm:$0xff]  ;;  %v187_v21 = vld [vmem:[%s726_s4 + $0xd0] sm:$0xff] }
   0x7   :  { %406 = vmatpush3.msra.mxu1 %v175_v7  ;;  %372 = vmatprep.subr.mxu0 %v70_v8  ;;  %v53_v14 = vld [vmem:[%s725_s2 + $0x60] sm:$0xff]  ;;  %v52_v18 = vld [vmem:[%s725_s2 + $0x58] sm:$0xff]  ;;  %v51_v22 = vld [vmem:[%s725_s2 + $0x50] sm:$0xff] }
   0x8   :  { %407 = vmatprep.subr.mxu1 %v190_v9  ;;  %v173_v15 = vld [vmem:[%s726_s4 + $0x60] sm:$0xff]  ;;  %373 = vmatpush3.msra.mxu0 %v54_v10  ;;  %v172_v19 = vld [vmem:[%s726_s4 + $0x58] sm:$0xff]  ;;  %v171_v23 = vld [vmem:[%s726_s4 + $0x50] sm:$0xff] }
   0x9   :  { %408 = vmatpush3.msra.mxu1 %v174_v11  ;;  %374 = vmatprep.subr.mxu0 %v69_v12  ;;  %v66_v24 = vld [vmem:[%s725_s2 + $0xc8] sm:$0xff]  ;;  %v65_v28 = vld [vmem:[%s725_s2 + $0xc0] sm:$0xff]  ;;  %v64_v32 = vld [vmem:[%s725_s2 + $0xb8] sm:$0xff] }
   0xa   :  { %409 = vmatprep.subr.mxu1 %v189_v13  ;;  %375 = vmatpush3.msra.mxu0 %v53_v14  ;;  %v186_v25 = vld [vmem:[%s726_s4 + $0xc8] sm:$0xff]  ;;  %v185_v29 = vld [vmem:[%s726_s4 + $0xc0] sm:$0xff]  ;;  %v184_v33 = vld [vmem:[%s726_s4 + $0xb8] sm:$0xff] }
   0xb   :  { %410 = vmatpush3.msra.mxu1 %v173_v15  ;;  %376 = vmatprep.subr.mxu0 %v68_v16  ;;  %v50_v26 = vld [vmem:[%s725_s2 + $0x48] sm:$0xff]  ;;  %v49_v30 = vld [vmem:[%s725_s2 + $0x40] sm:$0xff]  ;;  %v48_v34 = vld [vmem:[%s725_s2 + $0x38] sm:$0xff]  ;;  %v446_v15 = vmov 1983009808  }
   0xc   :  { %411 = vmatprep.subr.mxu1 %v188_v17  ;;  %377 = vmatpush3.msra.mxu0 %v52_v18  ;;  %v170_v27 = vld [vmem:[%s726_s4 + $0x48] sm:$0xff]  ;;  %v169_v31 = vld [vmem:[%s726_s4 + $0x40] sm:$0xff]  ;;  %v168_v35 = vld [vmem:[%s726_s4 + $0x38] sm:$0xff]  ;;  %v82_v16 = vunpack.c.l.s4 %v446_v15  ;;  %v84_v17 = vlaneseq }
   0xd   :  { %412 = vmatpush3.msra.mxu1 %v172_v19  ;;  %378 = vmatprep.subr.mxu0 %v67_v20  ;;  %v63_v36 = vld [vmem:[%s725_s2 + $0xb0] sm:$0xff]  ;;  %v62_v40 = vld [vmem:[%s725_s2 + $0xa8] sm:$0xff]  ;;  %v61_v44 = vld [vmem:[%s725_s2 + $0xa0] sm:$0xff] }
   0xe   :  { %413 = vmatprep.subr.mxu1 %v187_v21  ;;  %379 = vmatpush3.msra.mxu0 %v51_v22  ;;  %v183_v37 = vld [vmem:[%s726_s4 + $0xb0] sm:$0xff]  ;;  %v182_v41 = vld [vmem:[%s726_s4 + $0xa8] sm:$0xff]  ;;  %v181_v45 = vld [vmem:[%s726_s4 + $0xa0] sm:$0xff]  ;;  %v83_v18 = vunpack.c.0.s8 %v82_v16  ;;  %v85_v19 = vshrl.u32 %v84_v17, 7 }
   0xf   :  { %414 = vmatpush3.msra.mxu1 %v171_v23  ;;  %380 = vmatprep.subr.mxu0 %v66_v24  ;;  %v47_v38 = vld [vmem:[%s725_s2 + $0x30] sm:$0xff]  ;;  %v46_v42 = vld [vmem:[%s725_s2 + $0x28] sm:$0xff]  ;;  %v45_v46 = vld [vmem:[%s725_s2 + $0x20] sm:$0xff] }
  0x10   :  { %415 = vmatprep.subr.mxu1 %v186_v25  ;;  %381 = vmatpush3.msra.mxu0 %v50_v26  ;;  %v167_v39 = vld [vmem:[%s726_s4 + $0x30] sm:$0xff]  ;;  %v166_v43 = vld [vmem:[%s726_s4 + $0x28] sm:$0xff]  ;;  %v165_v47 = vld [vmem:[%s726_s4 + $0x20] sm:$0xff]  ;;  %v86_v20 = vsub.s32 %v83_v18, %v85_v19  ;;  %v447_v25 = vmov 1966171168  }
  0x11   :  { %416 = vmatpush3.msra.mxu1 %v170_v27  ;;  %382 = vmatprep.subr.mxu0 %v65_v28  ;;  %v630_v48 = vld [vmem:[%s727_s1] sm:$0xf]  ;;  %v60_v49 = vld [vmem:[%s725_s2 + $0x98] sm:$0xff]  ;;  %v59_v54 = vld [vmem:[%s725_s2 + $0x90] sm:$0xff]  ;;  %v278_v26 = vunpack.c.l.s4 %v447_v25 }
  0x12   :  { %417 = vmatprep.subr.mxu1 %v185_v29  ;;  %383 = vmatpush3.msra.mxu0 %v49_v30  ;;  %v180_v50 = vld [vmem:[%s726_s4 + $0x98] sm:$0xff]  ;;  %v25_v51 = vand.u32 2147483647, %v630_v48  ;;  %v179_v55 = vld [vmem:[%s726_s4 + $0x90] sm:$0xff]  ;;  %v58_v59 = vld [vmem:[%s725_s2 + $0x88] sm:$0xff]  ;;  %v24_v11 = vmax.f32 %v630_v48, 0.0 }
  0x13   :  { %418 = vmatpush3.msra.mxu1 %v169_v31  ;;  %384 = vmatprep.subr.mxu0 %v64_v32  ;;  %v44_v52 = vld [vmem:[%s725_s2 + $0x18] sm:$0xff]  ;;  %v43_v57 = vld [vmem:[%s725_s2 + $0x10] sm:$0xff]  ;;  %v178_v60 = vld [vmem:[%s726_s4 + $0x88] sm:$0xff]  ;;  %v279_v27 = vunpack.c.0.s8 %v278_v26 }
  0x14   :  { %419 = vmatprep.subr.mxu1 %v184_v33  ;;  %385 = vmatpush3.msra.mxu0 %v48_v34  ;;  %v164_v53 = vld [vmem:[%s726_s4 + $0x18] sm:$0xff]  ;;  %v26_v56 = vsub.f32 0.0, %v25_v51  ;;  %v163_v58 = vld [vmem:[%s726_s4 + $0x10] sm:$0xff]  ;;  %v42_v62 = vld [vmem:[%s725_s2 + $0x8] sm:$0xff] }
  0x15   :  { %420 = vmatpush3.msra.mxu1 %v168_v35  ;;  %386 = vmatprep.subr.mxu0 %v63_v36  ;;  %v162_v63 = vld [vmem:[%s726_s4 + $0x8] sm:$0xff]  ;;  %v57_v0 = vld [vmem:[%s725_s2 + $0x80] sm:$0xff]  ;;  %v282_v34 = vsub.s32 %v279_v27, %v85_v19 }
  0x16   :  { %421 = vmatprep.subr.mxu1 %v183_v37  ;;  %387 = vmatpush3.msra.mxu0 %v47_v38  ;;  %v27_v61 = vmul.f32 1.442695, %v26_v56  ;;  %v177_v1 = vld [vmem:[%s726_s4 + $0x80] sm:$0xff] }
  0x17   :  { %422 = vmatpush3.msra.mxu1 %v167_v39  ;;  %388 = vmatprep.subr.mxu0 %v62_v40  ;;  %v41_v2 = vld [vmem:[%s725_s2] sm:$0xff]  ;;  %v301_v40 = vsub.s32 0, %v85_v19 }
  0x18   :  { %423 = vmatprep.subr.mxu1 %v182_v41  ;;  %389 = vmatpush3.msra.mxu0 %v46_v42  ;;  %440 = vpow2.f32 %v27_v61  ;;  %v161_v3 = vld [vmem:[%s726_s4] sm:$0xff] }
  0x19   :  { %424 = vmatpush3.msra.mxu1 %v166_v43  ;;  %390 = vmatprep.subr.mxu0 %v61_v44  ;;  %v366_v30 = vld [vmem:[%s728_s3] ss:$0 sm:$0xff] }
  0x1a   :  { %425 = vmatprep.subr.mxu1 %v181_v45  ;;  %391 = vmatpush3.msra.mxu0 %v45_v46  ;;  %v367_v32 = vld [vmem:[%s729_s5] ss:$0 sm:$0xff] }
  0x1b   :  { %426 = vmatpush3.msra.mxu1 %v165_v47  ;;  %392 = vmatprep.subr.mxu0 %v60_v49  ;;  %v270_v46 = vld [vmem:[%s730_s0] sm:$0xff]  ;;  %v271_v47 = vld [vmem:[%s730_s0 + $0x8] sm:$0xff] }
  0x1c   :  { %427 = vmatprep.subr.mxu1 %v180_v50  ;;  %393 = vmatpush3.msra.mxu0 %v44_v52  ;;  %v273_v52 = vld [vmem:[%s730_s0 + $0x18] sm:$0xff] }
  0x1d   :  { %428 = vmatpush3.msra.mxu1 %v164_v53  ;;  %394 = vmatprep.subr.mxu0 %v59_v54  ;;  %v274_v53 = vld [vmem:[%s730_s0 + $0x20] sm:$0xff]  ;;  %v275_v54 = vld [vmem:[%s730_s0 + $0x28] sm:$0xf] }
  0x1e   :  { %429 = vmatprep.subr.mxu1 %v179_v55  ;;  %395 = vmatpush3.msra.mxu0 %v43_v57 }
  0x1f   :  { %430 = vmatpush3.msra.mxu1 %v163_v58  ;;  %396 = vmatprep.subr.mxu0 %v58_v59 }
  0x20   :  { %431 = vmatprep.subr.mxu1 %v178_v60  ;;  %397 = vmatpush3.msra.mxu0 %v42_v62 }
  0x21   :  { %432 = vmatpush3.msra.mxu1 %v162_v63  ;;  %398 = vmatprep.subr.mxu0 %v57_v0 }
  0x22   :  { %433 = vmatprep.subr.mxu1 %v177_v1  ;;  %399 = vmatpush3.msra.mxu0 %v41_v2 }
  0x23   :  { %434 = vmatpush3.msra.mxu1 %v161_v3 }
  0x25   :  { %v441_v4 = vpop.eup %440 }
  0x26   :  { %v29_v5 = vadd.f32 1.0, %v441_v4  ;;  %v32_v6 = vmul.f32 -0.5, %v441_v4  ;;  %v35_v8 = vand.u32 2147483647, %v441_v4 }
  0x28   :  { %442 = vlog2.f32 %v29_v5  ;;  %v33_v7 = vadd.f32 1.0, %v32_v6  ;;  %vm36_vm0 = vcmp.lt.f32.partialorder %v35_v8, 0.0004427343 }
  0x2a   :  { %v34_v9 = vmul.f32 %v441_v4, %v33_v7 }
  0x35   :  { %v443_v10 = vpop.eup %442 }
  0x36   :  { %v31_v12 = vmul.f32 0.6931472, %v443_v10 }
  0x38   :  { %v37_v13 = vsel %vm36_vm0, %v34_v9, %v31_v12 }
  0x39   :  { %v38_v14 = vadd.f32 %v37_v13, %v24_v11 }
  0x3b   :  { %444 = vtanh.f32 %v38_v14 }
  0x48   :  { %v445_v21 = vpop.eup %444 }
  0x49   :  { %v40_v22 = vmul.f32 %v445_v21, %v630_v48  ;;  %v272_v48 = vld [vmem:[%s730_s0 + $0x10] sm:$0xf] }
  0x4b   :  { %v87_v23 = vrot.slane %v40_v22, %v86_v20 }
  0x4d   :  { %v88_v24 = vcombine.high %v87_v23, %v87_v23 }
  0x4f   :  { %155 = vmatprep.mubr.f32.mxu0 %v88_v24  ;;  %264 = vmatprep.mubr.f32.mxu1 %v88_v24 }
  0x50   :  { %156 = vmatmul.mubr.f32.vlgmr.msra.gmra.mxu0 %v87_v23  ;;  %265 = vmatmul.mubr.f32.vlgmr.msra.gmra.mxu1 %v87_v23 }
 0x110   :  { %v400_v28 = vpop.f32.mrf.mxu0  ;;  %v435_v29 = vpop.f32.mrf.mxu1 }
 0x112   :  { %v401_v31 = vpop.f32.mrf.mxu0  ;;  %v436_v33 = vpop.f32.mrf.mxu1 }
 0x113   :  { %v402_v35 = vadd.f32 %v401_v31, %v400_v28  ;;  %v437_v36 = vadd.f32 %v436_v33, %v435_v29 }
 0x115   :  { %v158_v37 = vadd.f32 %v402_v35, %v366_v30  ;;  %v267_v38 = vadd.f32 %v437_v36, %v367_v32 }
 0x117   :  { %v283_v39 = vrot.slane %v158_v37, %v282_v34  ;;  %v322_v41 = vrot.slane %v267_v38, %v282_v34 }
 0x119   :  { %v284_v42 = vcombine.high %v283_v39, %v283_v39  ;;  %v291_v43 = vrot.slane %v283_v39, %v282_v34  ;;  %v323_v44 = vcombine.high %v322_v41, %v322_v41  ;;  %v330_v45 = vrot.slane %v322_v41, %v282_v34 }
 0x11b   :  { %v298_v49 = vrot.slane %v284_v42, %v282_v34  ;;  %v302_v50 = vrot.slane %v291_v43, %v301_v40  ;;  %v337_v51 = vrot.slane %v323_v44, %v282_v34  ;;  %v341_v55 = vrot.slane %v330_v45, %v301_v40 }
 0x11d   :  { %v306_v56 = vrot.slane %v298_v49, %v301_v40  ;;  %v309_v57 = vmul.f32 %v302_v50, %v270_v46  ;;  %v310_v58 = vmul.f32 %v302_v50, %v271_v47  ;;  %v311_v59 = vmul.f32 %v302_v50, %v272_v48 }
 0x11e   :  { %v345_v60 = vrot.slane %v337_v51, %v301_v40 }
 0x11f   :  { %v312_v61 = vmul.f32 %v306_v56, %v273_v52  ;;  %v313_v62 = vmul.f32 %v306_v56, %v274_v53  ;;  %v314_v63 = vmul.f32 %v306_v56, %v275_v54  ;;  %v348_v0 = vadd.f32 %v341_v55, %v309_v57 }
 0x120   :  { %v349_v1 = vadd.f32 %v341_v55, %v310_v58  ;;  %v350_v2 = vadd.f32 %v341_v55, %v311_v59 }
 0x121   :  { %v351_v3 = vadd.f32 %v345_v60, %v312_v61  ;;  %v352_v4 = vadd.f32 %v345_v60, %v313_v62  ;;  %v353_v5 = vadd.f32 %v345_v60, %v314_v63  ;;  %355 = vst.msk [vmem:[%s731_s6] sm:$0xff] %vm354_vm1, %v348_v0 }
 0x122   :  { %356 = vst.msk [vmem:[%s731_s6 + $0x8] sm:$0xff] %vm354_vm1, %v349_v1 }
 0x123   :  { %358 = vst.msk [vmem:[%s731_s6 + $0x10] sm:$0xf] %vm357_vm2, %v350_v2  ;;  %361 = vst.msk [vmem:[%s731_s6 + $0x28] sm:$0xf] %vm357_vm2, %v353_v5 }
 0x124   :  { %359 = vst.msk [vmem:[%s731_s6 + $0x18] sm:$0xff] %vm354_vm1, %v351_v3  ;;  %360 = vst.msk [vmem:[%s731_s6 + $0x20] sm:$0xff] %vm354_vm1, %v352_v4 }

</bundles_post_ra>
